<compile_context>
chip_gen: v7x
topology: tpu7x:2x2x1
jax: 0.10.0
libtpu: 0.0.40
codegen_flags: <defaults>
</compile_context>

<pallas_src>
import functools

import jax
import jax.numpy as jnp
import numpy as np
from jax.experimental import pallas as pl
from jax.experimental.pallas import tpu as pltpu

EMBED = 32
OUT_LANES = 128          # lane-dense output width (host slices [:, :2])


def _round_up(x, m):
    return (x + m - 1) // m * m


def _cdiv(a, b):
    return -(-a // b)


def _device_kind():
    try:
        return jax.devices()[0].device_kind.lower()
    except Exception:
        return ""


def _num_tensorcores():
    # v7x exposes 2 TensorCores per chip; v5e/v6e have 1.
    return 2 if "v7" in _device_kind() else 1


def _default_fuse_wa1():
    # Fuse the aggregator-layer-1 split on MRF chips (v5e/v6e); keep the
    # two-push form on v7x where the MRB accumulates in place for free.
    return "v7" not in _device_kind()


def credit_forward_kernel(xcat_ref, wcat_ref, wa1_ref, wa2_ref, wc1_ref,
                          wc2_ref, bias_ref, out_ref, *, embed, fuse_wa1):
    f32 = jnp.float32
    bf16 = jnp.bfloat16
    E = embed

    # Packed bias slab (f32):
    #   row0 = [bsum | bsum] (2E), row1 = ba1', row2 = ba2', row3 = bc1',
    #   row4 = bc2 zero-padded to 128 lanes.
    bsum2 = bias_ref[0:1, 0:2 * E]
    ba1 = bias_ref[1:2, 0:4 * E]
    ba2 = bias_ref[2:3, 0:E]
    bc1 = bias_ref[3:4, 0:E // 2]
    bc2 = bias_ref[4:5, :]                         # full 128 lanes (only [:2] nonzero)

    # x1[i,k] = sum_c Linear_c(X_c)[i,k] == Xcat @ Wcat + sum_c b_c.
    # Wcat is duplicated along N host-side ([Wcat | Wcat]) so both halves of
    # x1w equal x1; widening N 32->64 costs no extra MXU pushes.
    x1w = jnp.dot(xcat_ref[...], wcat_ref[...], preferred_element_type=f32) + bsum2
    x1 = x1w[:, 0:E]                               # (b, E) for the residual path

    if fuse_wa1:
        # h = [x1 | x1*x1] built with a pure-VPU lane select (no concat/XLU),
        # then one K=2E MXU push against the full wa1.
        lane = jax.lax.broadcasted_iota(jnp.int32, x1w.shape, 1)
        h = jnp.where(lane < E, x1w, x1w * x1w).astype(bf16)
        a = jnp.dot(h, wa1_ref[...], preferred_element_type=f32) + ba1
    else:
        # v7x: MRB accumulates in place, keep two K=E pushes (no XLU/VPU work).
        x2 = x1 * x1                               # einsum('ijk,ilk->ik') identity
        a = (jnp.dot(x1.astype(bf16), wa1_ref[0:E, :], preferred_element_type=f32)
             + jnp.dot(x2.astype(bf16), wa1_ref[E:2 * E, :], preferred_element_type=f32)
             + ba1)

    # aggregator (BatchNorm folded into weights/biases host-side)
    a = jnp.maximum(a, 0.0)
    a = jnp.dot(a.astype(bf16), wa2_ref[...], preferred_element_type=f32) + ba2
    a = jnp.maximum(a, 0.0)

    # classifier on residual (aggregator_out + x1)
    c = a + x1
    c = jnp.dot(c.astype(bf16), wc1_ref[...], preferred_element_type=f32) + bc1
    c = jnp.maximum(c, 0.0)
    # wc2 is zero-padded to 128 output lanes -> unmasked, lane-dense store.
    o = jnp.dot(c.astype(bf16), wc2_ref[...], preferred_element_type=f32) + bc2
    out_ref[...] = jnp.maximum(o, 0.0)             # (b_tile, 128); lanes 2.. are 0


def _choose_batch_tiling(B, b_tile):
    """Pick (tile, padded_B, steps): tile %16==0, >=2 steps on 2-TC chips."""
    n_steps = max(1, _cdiv(B, max(16, b_tile)))
    if _num_tensorcores() >= 2 and B > 16:
        n_steps = max(n_steps, 2)                  # keep both v7x TCs busy
    bt = _round_up(_cdiv(B, n_steps), 16)
    return bt, bt * n_steps, n_steps


def credit_forward(xcat, params, *, embed=EMBED, b_tile=4096, fuse_wa1=None,
                   vmem_limit_bytes=48 * 1024 * 1024):
    """xcat: (B, D_pad) float32; params: bf16 weights + packed f32 bias slab."""
    wcat_wide, wa1, wa2, wc1, wc2_pad, bias_pack = params
    B, Dp = xcat.shape
    if fuse_wa1 is None:
        fuse_wa1 = _default_fuse_wa1()

    bt, B_pad, n_steps = _choose_batch_tiling(B, b_tile)

    x = xcat.astype(jnp.bfloat16)
    if B_pad != B:
        x = jnp.pad(x, ((0, B_pad - B), (0, 0)))

    def resident(shape):
        return pl.BlockSpec(shape, lambda i: (0, 0))

    kernel = functools.partial(credit_forward_kernel, embed=embed,
                               fuse_wa1=fuse_wa1)
    out = pl.pallas_call(
        kernel,
        out_shape=jax.ShapeDtypeStruct((B_pad, OUT_LANES), jnp.float32),
        grid_spec=pl.GridSpec(
            grid=(n_steps,),
            in_specs=[
                pl.BlockSpec((bt, Dp), lambda i: (i, 0)),      # xcat: batch-tiled
                resident(wcat_wide.shape),
                resident(wa1.shape),
                resident(wa2.shape),
                resident(wc1.shape),
                resident(wc2_pad.shape),
                resident(bias_pack.shape),
            ],
            out_specs=pl.BlockSpec((bt, OUT_LANES), lambda i: (i, 0)),
        ),
        compiler_params=pltpu.CompilerParams(
            dimension_semantics=("parallel",),
            vmem_limit_bytes=vmem_limit_bytes),
    )(x, wcat_wide, wa1, wa2, wc1, wc2_pad, bias_pack)
    return out[:B, :2]


def fold_bn(gamma, beta, mean, var, eps=1e-5):
    scale = gamma / jnp.sqrt(var + eps)
    shift = beta - mean * scale
    return scale, shift


if __name__ == "__main__":
    key = jax.random.PRNGKey(0)
    B = 30                       # deliberately not a multiple of the batch tile
    E = EMBED
    col_dims = [1, 4, 3, 1, 6]   # scalar (MinMax) and one-hot column widths
    D = sum(col_dims)
    Dp = _round_up(D, 8)         # 15 -> 16 (sublane-aligned contraction dim)
    bf16 = jnp.bfloat16

    keys = iter(jax.random.split(key, 64))

    # per-column inputs and per-column Linear(d_c, E) encoders
    xcols, wcols, bcols = [], [], []
    for d in col_dims:
        xcols.append(jax.random.uniform(next(keys), (B, d), jnp.float32))
        wcols.append(jax.random.normal(next(keys), (d, E), jnp.float32) * 0.1)
        bcols.append(jax.random.normal(next(keys), (E,), jnp.float32) * 0.1)
    xcat = jnp.concatenate(xcols, axis=1)              # (B, D)
    wcat = jnp.concatenate(wcols, axis=0)              # (D, E)
    bsum = sum(bcols)                                  # (E,)
    xcat = jnp.pad(xcat, ((0, 0), (0, Dp - D)))        # zero-pad D -> 16
    wcat = jnp.pad(wcat, ((0, Dp - D), (0, 0)))

    def linear_params(kw, kb, d_in, d_out):
        w = jax.random.normal(kw, (d_in, d_out), jnp.float32) * 0.1
        b = jax.random.normal(kb, (d_out,), jnp.float32) * 0.1
        return w, b

    def bn_params(k, d):
        k1, k2, k3, k4 = jax.random.split(k, 4)
        gamma = 1.0 + 0.1 * jax.random.normal(k1, (d,), jnp.float32)
        beta = 0.1 * jax.random.normal(k2, (d,), jnp.float32)
        mean = 0.1 * jax.random.normal(k3, (d,), jnp.float32)
        var = jnp.abs(jax.random.normal(k4, (d,), jnp.float32)) + 0.5
        return fold_bn(gamma, beta, mean, var)

    wa1, ba1 = linear_params(next(keys), next(keys), 2 * E, 4 * E)
    s1, h1 = bn_params(next(keys), 4 * E)
    wa2, ba2 = linear_params(next(keys), next(keys), 4 * E, E)
    s2, h2 = bn_params(next(keys), E)
    wc1, bc1 = linear_params(next(keys), next(keys), E, E // 2)
    s3, h3 = bn_params(next(keys), E // 2)
    wc2, bc2 = linear_params(next(keys), next(keys), E // 2, 2)

    # fold eval-mode BatchNorm into the preceding Linear: W' = W*s, b' = b*s + h
    wa1f, ba1f = wa1 * s1[None, :], ba1 * s1 + h1
    wa2f, ba2f = wa2 * s2[None, :], ba2 * s2 + h2
    wc1f, bc1f = wc1 * s3[None, :], bc1 * s3 + h3

    # bf16 MXU operands.
    #   * wcat duplicated along N ([Wcat | Wcat]) so the kernel can build
    #     h = [x1 | x1*x1] without a lane concat or an extra matmul.
    #   * wc2 zero-padded to 128 output lanes for a lane-dense output store.
    wcat_wide = jnp.concatenate([wcat, wcat], axis=1).astype(bf16)   # (Dp, 2E)
    wa1_b = wa1f.astype(bf16)                                        # (2E, 4E)
    wa2_b = wa2f.astype(bf16)                                        # (4E, E)
    wc1_b = wc1f.astype(bf16)                                        # (E, E//2)
    wc2_pad = jnp.pad(wc2, ((0, 0), (0, OUT_LANES - 2))).astype(bf16)  # (E//2, 128)

    # pack all bias vectors into one (8, 128) f32 VMEM slab
    bias_pack = jnp.zeros((8, 128), jnp.float32)
    bias_pack = bias_pack.at[0, :E].set(bsum)
    bias_pack = bias_pack.at[0, E:2 * E].set(bsum)     # duplicated for the wide x1
    bias_pack = bias_pack.at[1, :4 * E].set(ba1f)
    bias_pack = bias_pack.at[2, :E].set(ba2f)
    bias_pack = bias_pack.at[3, :E // 2].set(bc1f)
    bias_pack = bias_pack.at[4, :2].set(bc2)

    params = [wcat_wide, wa1_b, wa2_b, wc1_b, wc2_pad, bias_pack]

    # reference with matching numerics (bf16 MXU operands, f32 everything else)
    wcat_b = wcat.astype(bf16)
    wa1x, wa1q = wa1_b[:E], wa1_b[E:]

    def ref_forward(x):
        x1 = jnp.dot(x.astype(bf16), wcat_b, preferred_element_type=jnp.float32) + bsum[None, :]
        x2 = x1 * x1
        a = (jnp.dot(x1.astype(bf16), wa1x, preferred_element_type=jnp.float32)
             + jnp.dot(x2.astype(bf16), wa1q, preferred_element_type=jnp.float32)
             + ba1f[None, :])
        a = jnp.maximum(a, 0.0)
        a = jnp.dot(a.astype(bf16), wa2_b, preferred_element_type=jnp.float32) + ba2f[None, :]
        a = jnp.maximum(a, 0.0)
        c = a + x1
        c = jnp.dot(c.astype(bf16), wc1_b, preferred_element_type=jnp.float32) + bc1f[None, :]
        c = jnp.maximum(c, 0.0)
        o = jnp.dot(c.astype(bf16), wc2.astype(bf16), preferred_element_type=jnp.float32) + bc2[None, :]
        return jnp.maximum(o, 0.0)

    ref = np.asarray(ref_forward(xcat))

    # original full-f32, unfolded-BN forward (loose sanity check)
    x1 = xcat @ wcat + bsum[None, :]
    h = jnp.concatenate([x1, x1 * x1], axis=1)
    a = jnp.maximum((h @ wa1 + ba1[None, :]) * s1[None, :] + h1[None, :], 0.0)
    a = jnp.maximum((a @ wa2 + ba2[None, :]) * s2[None, :] + h2[None, :], 0.0)
    c = a + x1
    c = jnp.maximum((c @ wc1 + bc1[None, :]) * s3[None, :] + h3[None, :], 0.0)
    ref32 = np.asarray(jnp.maximum(c @ wc2 + bc2[None, :], 0.0))

    # Exercise both aggregator-layer-1 strategies (fused K=64 push vs. the
    # v7x two-push form) with a tiny tile so the batch grid (>=2 steps) and
    # tail padding are covered, then once with the production defaults.
    for fuse in (True, False):
        out = jax.block_until_ready(
            credit_forward(xcat, params, b_tile=16, fuse_wa1=fuse))
        assert out.shape == (B, 2) and out.dtype == jnp.float32
        np.testing.assert_allclose(np.asarray(out), ref, rtol=1e-2, atol=1e-2)
        np.testing.assert_allclose(np.asarray(out), ref32, rtol=0.08, atol=0.08)

    out = jax.block_until_ready(credit_forward(xcat, params))   # chip-tuned defaults
    assert out.shape == (B, 2) and out.dtype == jnp.float32
    np.testing.assert_allclose(np.asarray(out), ref, rtol=1e-2, atol=1e-2)
    np.testing.assert_allclose(np.asarray(out), ref32, rtol=0.08, atol=0.08)

    print("KERNEL_OK")
</pallas_src>

<mosaic_0001>
module attributes {stable_mosaic.version = 11 : i64} {
  func.func @credit_forward_kernel(%arg0: i32, %arg1: memref<16x16xbf16, #tpu.memory_space<vmem>>, %arg2: memref<16x64xbf16, #tpu.memory_space<vmem>>, %arg3: memref<64x128xbf16, #tpu.memory_space<vmem>>, %arg4: memref<128x32xbf16, #tpu.memory_space<vmem>>, %arg5: memref<32x16xbf16, #tpu.memory_space<vmem>>, %arg6: memref<16x128xbf16, #tpu.memory_space<vmem>>, %arg7: memref<8x128xf32, #tpu.memory_space<vmem>>, %arg8: memref<16x128xf32, #tpu.memory_space<vmem>>) attributes {dimension_semantics = [#tpu.dimension_semantics<parallel>], iteration_bounds = array<i64: 2>, scalar_prefetch = 0 : i64, scratch_operands = 0 : i64, tpu.core_type = #tpu.core_type<tc>, window_params = [{transform_indices = @transform_0, window_bounds = array<i64: 16, 16>}, {pipeline_mode = #tpu.pipeline_mode<synchronous>, transform_indices = @transform_1, window_bounds = array<i64: 16, 64>}, {pipeline_mode = #tpu.pipeline_mode<synchronous>, transform_indices = @transform_2, window_bounds = array<i64: 64, 128>}, {pipeline_mode = #tpu.pipeline_mode<synchronous>, transform_indices = @transform_3, window_bounds = array<i64: 128, 32>}, {pipeline_mode = #tpu.pipeline_mode<synchronous>, transform_indices = @transform_4, window_bounds = array<i64: 32, 16>}, {pipeline_mode = #tpu.pipeline_mode<synchronous>, transform_indices = @transform_5, window_bounds = array<i64: 16, 128>}, {pipeline_mode = #tpu.pipeline_mode<synchronous>, transform_indices = @transform_6, window_bounds = array<i64: 8, 128>}, {transform_indices = @transform_7, window_bounds = array<i64: 16, 128>}]} {
    %c0 = arith.constant 0 : index
    %c0_0 = arith.constant 0 : index
    %0 = vector.load %arg7[%c0, %c0_0] : memref<8x128xf32, #tpu.memory_space<vmem>>, vector<1x64xf32>
    %c1 = arith.constant 1 : index
    %c0_1 = arith.constant 0 : index
    %1 = vector.load %arg7[%c1, %c0_1] : memref<8x128xf32, #tpu.memory_space<vmem>>, vector<1x128xf32>
    %c2 = arith.constant 2 : index
    %c0_2 = arith.constant 0 : index
    %2 = vector.load %arg7[%c2, %c0_2] : memref<8x128xf32, #tpu.memory_space<vmem>>, vector<1x32xf32>
    %c3 = arith.constant 3 : index
    %c0_3 = arith.constant 0 : index
    %3 = vector.load %arg7[%c3, %c0_3] : memref<8x128xf32, #tpu.memory_space<vmem>>, vector<1x16xf32>
    %c4 = arith.constant 4 : index
    %c0_4 = arith.constant 0 : index
    %4 = vector.load %arg7[%c4, %c0_4] : memref<8x128xf32, #tpu.memory_space<vmem>>, vector<1x128xf32>
    %c0_5 = arith.constant 0 : index
    %c0_6 = arith.constant 0 : index
    %5 = vector.load %arg1[%c0_5, %c0_6] : memref<16x16xbf16, #tpu.memory_space<vmem>>, vector<16x16xbf16>
    %c0_7 = arith.constant 0 : index
    %c0_8 = arith.constant 0 : index
    %6 = vector.load %arg2[%c0_7, %c0_8] : memref<16x64xbf16, #tpu.memory_space<vmem>>, vector<16x64xbf16>
    %cst = arith.constant dense<0.000000e+00> : vector<16x64xf32>
    %7 = tpu.matmul %5, %6, %cst {dimension_numbers = #tpu.dot_dimension_numbers<[1], [0], [0], [1], [0, 0, 1, 1], [], []>} : vector<16x16xbf16>, vector<16x64xbf16>, vector<16x64xf32> -> vector<16x64xf32>
    %8 = vector.broadcast %0 : vector<1x64xf32> to vector<16x64xf32>
    %9 = arith.addf %7, %8 : vector<16x64xf32>
    %10 = vector.extract_strided_slice %9 {offsets = [0, 0], sizes = [16, 32], strides = [1, 1]} : vector<16x64xf32> to vector<16x32xf32>
    %11 = tpu.iota {dimensions = array<i32: 1>} : vector<16x64xi32>
    %c32_i32 = arith.constant 32 : i32
    %12 = vector.broadcast %c32_i32 : i32 to vector<16x64xi32>
    %13 = arith.cmpi slt, %11, %12 : vector<16x64xi32>
    %14 = arith.mulf %9, %9 : vector<16x64xf32>
    %15 = arith.select %13, %9, %14 : vector<16x64xi1>, vector<16x64xf32>
    %16 = arith.truncf %15 : vector<16x64xf32> to vector<16x64xbf16>
    %c0_9 = arith.constant 0 : index
    %c0_10 = arith.constant 0 : index
    %17 = vector.load %arg3[%c0_9, %c0_10] : memref<64x128xbf16, #tpu.memory_space<vmem>>, vector<64x128xbf16>
    %cst_11 = arith.constant dense<0.000000e+00> : vector<16x128xf32>
    %18 = tpu.matmul %16, %17, %cst_11 {dimension_numbers = #tpu.dot_dimension_numbers<[1], [0], [0], [1], [0, 0, 1, 1], [], []>} : vector<16x64xbf16>, vector<64x128xbf16>, vector<16x128xf32> -> vector<16x128xf32>
    %19 = vector.broadcast %1 : vector<1x128xf32> to vector<16x128xf32>
    %20 = arith.addf %18, %19 : vector<16x128xf32>
    %cst_12 = arith.constant 0.000000e+00 : f32
    %21 = vector.broadcast %cst_12 : f32 to vector<16x128xf32>
    %22 = arith.maximumf %20, %21 : vector<16x128xf32>
    %23 = arith.truncf %22 : vector<16x128xf32> to vector<16x128xbf16>
    %c0_13 = arith.constant 0 : index
    %c0_14 = arith.constant 0 : index
    %24 = vector.load %arg4[%c0_13, %c0_14] : memref<128x32xbf16, #tpu.memory_space<vmem>>, vector<128x32xbf16>
    %cst_15 = arith.constant dense<0.000000e+00> : vector<16x32xf32>
    %25 = tpu.matmul %23, %24, %cst_15 {dimension_numbers = #tpu.dot_dimension_numbers<[1], [0], [0], [1], [0, 0, 1, 1], [], []>} : vector<16x128xbf16>, vector<128x32xbf16>, vector<16x32xf32> -> vector<16x32xf32>
    %26 = vector.broadcast %2 : vector<1x32xf32> to vector<16x32xf32>
    %27 = arith.addf %25, %26 : vector<16x32xf32>
    %cst_16 = arith.constant 0.000000e+00 : f32
    %28 = vector.broadcast %cst_16 : f32 to vector<16x32xf32>
    %29 = arith.maximumf %27, %28 : vector<16x32xf32>
    %30 = arith.addf %29, %10 : vector<16x32xf32>
    %31 = arith.truncf %30 : vector<16x32xf32> to vector<16x32xbf16>
    %c0_17 = arith.constant 0 : index
    %c0_18 = arith.constant 0 : index
    %32 = vector.load %arg5[%c0_17, %c0_18] : memref<32x16xbf16, #tpu.memory_space<vmem>>, vector<32x16xbf16>
    %cst_19 = arith.constant dense<0.000000e+00> : vector<16x16xf32>
    %33 = tpu.matmul %31, %32, %cst_19 {dimension_numbers = #tpu.dot_dimension_numbers<[1], [0], [0], [1], [0, 0, 1, 1], [], []>} : vector<16x32xbf16>, vector<32x16xbf16>, vector<16x16xf32> -> vector<16x16xf32>
    %34 = vector.broadcast %3 : vector<1x16xf32> to vector<16x16xf32>
    %35 = arith.addf %33, %34 : vector<16x16xf32>
    %cst_20 = arith.constant 0.000000e+00 : f32
    %36 = vector.broadcast %cst_20 : f32 to vector<16x16xf32>
    %37 = arith.maximumf %35, %36 : vector<16x16xf32>
    %38 = arith.truncf %37 : vector<16x16xf32> to vector<16x16xbf16>
    %c0_21 = arith.constant 0 : index
    %c0_22 = arith.constant 0 : index
    %39 = vector.load %arg6[%c0_21, %c0_22] : memref<16x128xbf16, #tpu.memory_space<vmem>>, vector<16x128xbf16>
    %cst_23 = arith.constant dense<0.000000e+00> : vector<16x128xf32>
    %40 = tpu.matmul %38, %39, %cst_23 {dimension_numbers = #tpu.dot_dimension_numbers<[1], [0], [0], [1], [0, 0, 1, 1], [], []>} : vector<16x16xbf16>, vector<16x128xbf16>, vector<16x128xf32> -> vector<16x128xf32>
    %41 = vector.broadcast %4 : vector<1x128xf32> to vector<16x128xf32>
    %42 = arith.addf %40, %41 : vector<16x128xf32>
    %cst_24 = arith.constant 0.000000e+00 : f32
    %43 = vector.broadcast %cst_24 : f32 to vector<16x128xf32>
    %44 = arith.maximumf %42, %43 : vector<16x128xf32>
    %c0_25 = arith.constant 0 : index
    %c0_26 = arith.constant 0 : index
    %45 = vector.load %arg8[%c0_25, %c0_26] : memref<16x128xf32, #tpu.memory_space<vmem>>, vector<16x128xf32>
    tpu.vector_store %arg8[%c0_25, %c0_26], %44 {strides = array<i32>} : memref<16x128xf32, #tpu.memory_space<vmem>>, vector<16x128xf32>,
    return
  }
  func.func @transform_0(%arg0: i32) -> (i32, i32) {
    %c0_i32 = arith.constant 0 : i32
    %c0_i32_0 = arith.constant 0 : i32
    return %arg0, %c0_i32 : i32, i32
  }
  func.func @transform_1(%arg0: i32) -> (i32, i32) {
    %c0_i32 = arith.constant 0 : i32
    %c0_i32_0 = arith.constant 0 : i32
    %c0_i32_1 = arith.constant 0 : i32
    return %c0_i32, %c0_i32_0 : i32, i32
  }
  func.func @transform_2(%arg0: i32) -> (i32, i32) {
    %c0_i32 = arith.constant 0 : i32
    %c0_i32_0 = arith.constant 0 : i32
    %c0_i32_1 = arith.constant 0 : i32
    return %c0_i32, %c0_i32_0 : i32, i32
  }
  func.func @transform_3(%arg0: i32) -> (i32, i32) {
    %c0_i32 = arith.constant 0 : i32
    %c0_i32_0 = arith.constant 0 : i32
    %c0_i32_1 = arith.constant 0 : i32
    return %c0_i32, %c0_i32_0 : i32, i32
  }
  func.func @transform_4(%arg0: i32) -> (i32, i32) {
    %c0_i32 = arith.constant 0 : i32
    %c0_i32_0 = arith.constant 0 : i32
    %c0_i32_1 = arith.constant 0 : i32
    return %c0_i32, %c0_i32_0 : i32, i32
  }
  func.func @transform_5(%arg0: i32) -> (i32, i32) {
    %c0_i32 = arith.constant 0 : i32
    %c0_i32_0 = arith.constant 0 : i32
    %c0_i32_1 = arith.constant 0 : i32
    return %c0_i32, %c0_i32_0 : i32, i32
  }
  func.func @transform_6(%arg0: i32) -> (i32, i32) {
    %c0_i32 = arith.constant 0 : i32
    %c0_i32_0 = arith.constant 0 : i32
    %c0_i32_1 = arith.constant 0 : i32
    return %c0_i32, %c0_i32_0 : i32, i32
  }
  func.func @transform_7(%arg0: i32) -> (i32, i32) {
    %c0_i32 = arith.constant 0 : i32
    %c0_i32_0 = arith.constant 0 : i32
    return %arg0, %c0_i32 : i32, i32
  }
}

</mosaic_0001>

<bundles_post_ra>
// kernel: tpu_custom_call.1
= control target key start
LH: loop header
LB: loop body
LE: loop exit
PB: predicated region body
PF: predicated region fallthrough
CT: control target
= control target key end

     0   :  { %12 = vsyncpa [#allocation3], 0  ;;  %s1234_s0 = inlined_call_operand.vmem [shape: bf16[32,16], index: 0, kind: input, shape index: {}]   ;;  %s1235_s1 = inlined_call_operand.vmem [shape: bf16[16,64], index: 1, kind: input, shape index: {}]   ;;  %s1236_s2 = inlined_call_operand.vmem [shape: bf16[64,128], index: 2, kind: input, shape index: {}]   ;;  %s1237_s3 = inlined_call_operand.vmem [shape: bf16[128,32], index: 3, kind: input, shape index: {}]   ;;  %s1238_s4 = inlined_call_operand.vmem [shape: bf16[32,16], index: 4, kind: input, shape index: {}]   ;;  %s1239_s5 = inlined_call_operand.vmem [shape: bf16[16,128], index: 5, kind: input, shape index: {}]   ;;  %s1240_s6 = inlined_call_operand.vmem [shape: f32[8,128], index: 6, kind: input, shape index: {}]   ;;  %s1241_s7 = inlined_call_operand.hbm [shape: f32[32,128], index: 7, kind: output, shape index: {}]  }
   0x1   :  { %14 = vsyncpa [#allocation3 + $0x1], 0  ;;  %s1041_s24 = smov 0   ;;  %s1043_s25 = smov 0  }
   0x2   :  { %s1045_s26 = smov 0   ;;  %s1047_s27 = smov 0  }
   0x3 LB: > { %s1062_s28 = sadd.s32 4294967295, %s994_s27   ;;  %s760_s29 = sadd.s32 4294967294, %s994_s27   ;;  %s994_s27 = sphi %s1047_s27, %s1247_s27   ;;  %s990_s26 = sphi %s1045_s26, %s1246_s26   ;;  %s986_s25 = sphi %s1043_s25, %s1245_s25   ;;  %s982_s24 = sphi %s1041_s24, %s1244_s24  }
   0x4   : > { %s1066_s30 = sadd.s32 1, %s994_s27   ;;  %s179_s8 = sadd.s32 1, %s990_s26 }
   0x5   : > { %s176_s9 = ssub.s32 %s994_s27, %s1066_s30  ;;  %p189_p0 = scmp.ne.s32.totalorder %s990_s26, %s986_s25 }
   0x6   : > { %p177_p1 = scmp.eq.s32.totalorder %s176_s9, 0  ;;  %p190_p2 = scmp.eq.s32.totalorder %s1062_s28, 1 }
   0x7   : > { %p195_p3 = scmp.ne.s32.totalorder %s986_s25, %s982_s24  ;;  %p196_p4 = scmp.eq.s32.totalorder %s760_s29, 1 }
   0x8   : > { %s1077_s10 = scalar_select %p177_p1, %s990_s26, %s179_s8  }
   0x9   : > { %p1079_p5 = por %p190_p2, %p189_p0  ;;  %p1083_p6 = por %p196_p4, %p195_p3 }
   0xa   : > { %p763_p7 = scmp.ge.s32.totalorder %s994_s27, 1  ;;  %p241_p8 = scmp.lt.s32.totalorder %s994_s27, 3 }
   0xc   : > { %p242_p9 = pnand %p763_p7, %p241_p8 }
   0xd   : > { %v915_v0 = vld [vmem:[%s1235_s1] sm:$0xff] (!%p242_p9)   ;;  %v996_v1 = vmov (!%p242_p9), 0.0   ;;  %s765_s15 = sshll.u32 (!%p242_p9), %s1062_s28, 1  ;;  %vm997_vm0 = vmmov (!%p242_p9), 0   ;;  %v918_v3 = vld [vmem:[%s1236_s2 + $0x8] sm:$0xff] (!%p242_p9)   ;;  %vm305_vm1 = vcmask (!%p242_p9), 130048   ;;  %v350_v13 = vlaneseq (!%p242_p9) }
   0xe   : > { %245 = sbr.rel (%p242_p9) target bundleno = 1141 (0x475), region = 48  ;;  %820 = vmatprep.subr.bf16.mxu0 (!%p242_p9), %v996_v1  ;;  %826 = vmatprep.subr.bf16.mxu1 (!%p242_p9), %v996_v1  ;;  %v917_v2 = vld [vmem:[%s1236_s2] sm:$0xff] (!%p242_p9)   ;;  %p274_p10 = scmp.lt.s32.totalorder (!%p242_p9), %s765_s15, 3  ;;  %v919_v5 = vld [vmem:[%s1236_s2 + $0x10] sm:$0xff] (!%p242_p9)   ;;  %v920_v6 = vld [vmem:[%s1236_s2 + $0x18] sm:$0xff] (!%p242_p9)   ;;  %vm394_vm3 = vcmask (!%p242_p9), 523264  }
   0xf   : > { %821 = vmatpush3.bf16.msra.mxu0 (!%p242_p9), %v915_v0  ;;  %822 = vmatprep.mubr.msk.bf16.mxu0 (!%p242_p9), %vm997_vm0, %v996_v1  ;;  %v921_v7 = vld [vmem:[%s1237_s3] sm:$0xff] (!%p242_p9)   ;;  %v922_v8 = vld [vmem:[%s1237_s3 + $0x8] sm:$0xff] (!%p242_p9)   ;;  %v923_v9 = vld [vmem:[%s1237_s3 + $0x10] sm:$0xff] (!%p242_p9)   ;;  %v351_v16 = vand.u32 (!%p242_p9), 127, %v350_v13  ;;  %vm576_vm4 = vcmask (!%p242_p9), 261120   ;;  %s270_s16 = sand.u32 (!%p242_p9), 1, %s986_s25  }
  0x10   : > { %827 = vmatpush3.bf16.msra.mxu1 (!%p242_p9), %v917_v2  ;;  %834 = vmatprep.mubr.msk.bf16.mxu1 (!%p242_p9), %vm997_vm0, %v996_v1  ;;  %v924_v10 = vld [vmem:[%s1237_s3 + $0x18] sm:$0xff] (!%p242_p9)   ;;  %v925_v11 = vld [vmem:[%s1237_s3 + $0x20] sm:$0xff] (!%p242_p9)   ;;  %v926_v12 = vld [vmem:[%s1237_s3 + $0x28] sm:$0xff] (!%p242_p9)   ;;  %s764_s17 = sshll.u32 (!%p242_p9), %s270_s16, 4  ;;  %s798_s22 = sshll.u32 (!%p242_p9), %s1062_s28, 8 }
  0x11   : > { %828 = vmatprep.subr.bf16.mxu1 (!%p242_p9), %v996_v1  ;;  %838 = vmatprep.subr.bf16.mxu0 (!%p242_p9), %v996_v1  ;;  %v767_v14 = vld [vmem:[%s1240_s6] ss:$0 sm:$0xff] (!%p242_p9)  ;;  %vm352_vm2 = vcmp.lt.s32.totalorder (!%p242_p9), %v351_v16, 32  ;;  %v927_v27 = vld [vmem:[%s1237_s3 + $0x30] sm:$0xff] (!%p242_p9)   ;;  %v928_v28 = vld [vmem:[%s1237_s3 + $0x38] sm:$0xff] (!%p242_p9)   ;;  %s1191_s8 = scalar_lea.hbm (!%p242_p9), %s1241_s7, %s798_s22  ;;  %s1193_s9 = scalar_lea.sflag (!%p242_p9), [#allocation3], %s270_s16 }
  0x12   : > { %v771_v29 = vld [vmem:[%s1240_s6 + $0x1] ss:$0 sm:$0xff] (!%p242_p9)  ;;  %v930_v40 = vld [vmem:[%s1238_s4 + $0x8] sm:$0xff] (!%p242_p9)   ;;  %v777_v41 = vld [vmem:[%s1240_s6 + $0x2] ss:$0 sm:$0xff] (!%p242_p9)  ;;  %s998_s13 = smov (!%p242_p9), [#allocation2]  }
  0x13   : > { %v929_v39 = vld [vmem:[%s1238_s4] sm:$0xff] (!%p242_p9)   ;;  %s936_s14 = sshll.u32 (!%p242_p9), %s998_s13, 4  ;;  %s937_s14 = int_to_ptr.vmem [resolvable:$false] %s936_s14 }
  0x14   : > { %829 = vmatpush3.bf16.msra.mxu1 (!%p242_p9), %v918_v3  ;;  %v931_v53 = vld [vmem:[%s1239_s5] sm:$0xff] (!%p242_p9)  }
  0x15   : > { %s1249_s15 = smov (!%p274_p10, %s765_s15), 3  ;;  %830 = vmatprep.subr.bf16.mxu1 %v996_v1  ;;  %v786_v54 = vld [vmem:[%s1240_s6 + $0x3] ss:$0 sm:$0xff]  ;;  %v790_v0 = vld [vmem:[%s1240_s6 + $0x4] ss:$0 sm:$0xff] }
  0x16   : > { %s766_s20 = sshll.u32 %s1249_s15, 2  ;;  %s938_s15 = scalar_lea.vmem %s937_s14, 512 }
  0x17   : > { %s277_s23 = scalar_lea.vmem %s1234_s0, %s766_s20  ;;  %s272_s20 = scalar_lea.vmem [#allocation2], %s764_s17 }
  0x18   : > { %v916_v4 = vld [vmem:[%s277_s23] sm:$0xff]   ;;  %831 = vmatpush3.bf16.msra.mxu1 %v919_v5  ;;  %s698_s21 = sshll.u32 %s272_s20, 4  ;;  %s1186_s21 = int_to_ptr.vmem [resolvable:$true] %s698_s21 }
  0x19   : > { %823 = vmatmul.mubr.msk.bf16.vlgmr.msra.gmra.mrb[0].mxu0 %vm305_vm1, %v916_v4  ;;  %832 = vmatprep.subr.bf16.mxu1 %v996_v1  ;;  %s932_s28 = scalar_lea.vmem %s1186_s21, 256  ;;  %p939_p0 = scmp.lt.s32.totalorder %s1186_s21, %s937_s14 }
  0x1a   : > { %854 = vmatprep.mubr.msk.bf16.mxu0 %vm997_vm0, %v996_v1  ;;  %839 = vmatpush3.bf16.msra.mxu0 %v921_v7  ;;  %p933_p11 = scmp.ne.s32.totalorder %s1186_s21, %s932_s28  ;;  %p940_p1 = scmp.lt.s32.totalorder %s938_s15, %s932_s28 }
  0x1b   : > { %840 = vmatprep.subr.bf16.mxu0 %v996_v1 }
  0x1c   : > { %833 = vmatpush3.bf16.msra.mxu1 %v920_v6  ;;  %p934_p12 = pnand %p933_p11, %p1079_p5  ;;  %p941_p2 = por %p940_p1, %p939_p0 }
  0x1d   : > { %858 = vmatprep.subr.bf16.mxu1 %v996_v1 }
  0x1e   : > { %841 = vmatpush3.bf16.msra.mxu0 %v922_v8  ;;  %p935_p13 = pneg %p934_p12 }
  0x1f   : > { %842 = vmatprep.subr.bf16.mxu0 %v996_v1 }
  0x20   : > { %p942_p3 = pnand %p941_p2, %p935_p13 }
  0x22   : > { %843 = vmatpush3.bf16.msra.mxu0 %v923_v9 }
  0x23   : > { %844 = vmatprep.subr.bf16.mxu0 %v996_v1 }
  0x26   : > { %845 = vmatpush3.bf16.msra.mxu0 %v924_v10 }
  0x27   : > { %846 = vmatprep.subr.bf16.mxu0 %v996_v1 }
  0x2a   : > { %847 = vmatpush3.bf16.msra.mxu0 %v925_v11 }
  0x2b   : > { %848 = vmatprep.subr.bf16.mxu0 %v996_v1 }
  0x2e   : > { %849 = vmatpush3.bf16.msra.mxu0 %v926_v12 }
  0x2f   : > { %850 = vmatprep.subr.bf16.mxu0 %v996_v1 }
  0x32   : > { %851 = vmatpush3.bf16.msra.mxu0 %v927_v27 }
  0x33   : > { %852 = vmatprep.subr.bf16.mxu0 %v996_v1 }
  0x36   : > { %853 = vmatpush3.bf16.msra.mxu0 %v928_v28 }
  0xec   : > { %v343_v15 = vpop.f32.mrb[0].mxu0 }
  0xed   : > { %v344_v17 = vadd.f32 %v767_v14, %v343_v15  ;;  %v824_v18 = vpop.f32.mrb[1].mxu0 }
  0xee   : > { %v346_v19 = vpop.f32.mrb[2].mxu0 }
  0xef   : > { %v353_v20 = vmul.f32 %v344_v17, %v344_v17  ;;  %v347_v21 = vadd.f32 %v767_v14, %v346_v19  ;;  %v825_v22 = vpop.f32.mrb[3].mxu0 }
  0xf1   : > { %v354_v23 = vmul.f32 %v347_v21, %v347_v21  ;;  %v355_v24 = vsel %vm352_vm2, %v344_v17, %v353_v20 }
  0xf3   : > { %v356_v25 = vsel %vm352_vm2, %v347_v21, %v354_v23 }
  0xf4   : > { %v357_v26 = vpack.c.bf16 %v356_v25, %v355_v24 }
  0xf6   : > { %835 = vmatmul.mubr.msk.bf16.vlgmr.msra.gmra.mrb[0].mxu1 %vm394_vm3, %v357_v26 }
  0xf7   : > { %862 = vmatprep.mubr.msk.bf16.mxu1 %vm997_vm0, %v996_v1  ;;  %859 = vmatpush3.bf16.msra.mxu1 %v929_v39 }
  0xf8   : > { %860 = vmatprep.subr.bf16.mxu1 %v996_v1 }
  0xfb   : > { %861 = vmatpush3.bf16.msra.mxu1 %v930_v40 }
  0xfc   : > { %866 = vmatprep.subr.bf16.mxu1 %v996_v1 }
 0x1c9   : > { %v432_v30 = vpop.f32.mrb[0].mxu1 }
 0x1ca   : > { %v433_v31 = vadd.f32 %v771_v29, %v432_v30  ;;  %v836_v32 = vpop.f32.mrb[1].mxu1 }
 0x1cb   : > { %v435_v33 = vpop.f32.mrb[2].mxu1 }
 0x1cc   : > { %v436_v34 = vadd.f32 %v771_v29, %v435_v33  ;;  %v837_v35 = vpop.f32.mrb[3].mxu1  ;;  %v439_v36 = vmax.f32 %v433_v31, 0.0 }
 0x1ce   : > { %v440_v37 = vmax.f32 %v436_v34, 0.0 }
 0x1d0   : > { %v441_v38 = vpack.c.bf16 %v440_v37, %v439_v36 }
 0x1d2   : > { %855 = vmatmul.mubr.bf16.vlgmr.msra.gmra.mrb[4].mxu0 %v441_v38 }
 0x2a5   : > { %v544_v42 = vpop.f32.mrb[4].mxu0 }
 0x2a6   : > { %v545_v43 = vadd.f32 %v777_v41, %v544_v42  ;;  %v856_v44 = vpop.f32.mrb[5].mxu0 }
 0x2a7   : > { %v547_v45 = vpop.f32.mrb[6].mxu0 }
 0x2a8   : > { %v551_v46 = vmax.f32 %v545_v43, 0.0  ;;  %v548_v47 = vadd.f32 %v777_v41, %v547_v45  ;;  %v857_v48 = vpop.f32.mrb[7].mxu0 }
 0x2aa   : > { %v552_v49 = vmax.f32 %v548_v47, 0.0  ;;  %v553_v50 = vadd.f32 %v551_v46, %v344_v17 }
 0x2ac   : > { %v554_v51 = vadd.f32 %v552_v49, %v347_v21 }
 0x2ae   : > { %v555_v52 = vpack.c.bf16 %v554_v51, %v553_v50 }
 0x2b0   : > { %863 = vmatmul.mubr.msk.bf16.vlgmr.msra.gmra.mrb[4].mxu1 %vm576_vm4, %v555_v52 }
 0x2b1   : > { %868 = vmatprep.mubr.msk.bf16.mxu1 %vm997_vm0, %v996_v1  ;;  %867 = vmatpush3.bf16.msra.mxu1 %v931_v53 }
 0x383   : > { %v614_v55 = vpop.f32.mrb[4].mxu1 }
 0x384   : > { %v615_v56 = vadd.f32 %v786_v54, %v614_v55  ;;  %v864_v57 = vpop.f32.mrb[5].mxu1 }
 0x385   : > { %v617_v58 = vpop.f32.mrb[6].mxu1 }
 0x386   : > { %v618_v59 = vadd.f32 %v786_v54, %v617_v58  ;;  %v865_v60 = vpop.f32.mrb[7].mxu1  ;;  %v621_v61 = vmax.f32 %v615_v56, 0.0 }
 0x388   : > { %v622_v62 = vmax.f32 %v618_v59, 0.0 }
 0x38a   : > { %v623_v63 = vpack.c.bf16 %v622_v62, %v621_v61 }
 0x38c   : > { %869 = vmatmul.mubr.msk.bf16.vlgmr.msra.gmra.mrb[8].mxu1 %vm305_vm1, %v623_v63 }
 0x45f   : > { %v673_v1 = vpop.f32.mrb[8].mxu1 }
 0x460   : > { %v674_v2 = vadd.f32 %v790_v0, %v673_v1  ;;  %v870_v3 = vpop.f32.mrb[9].mxu1 }
 0x461   : > { %v676_v4 = vpop.f32.mrb[10].mxu1 }
 0x462   : > { %v680_v5 = vmax.f32 %v674_v2, 0.0  ;;  %v677_v6 = vadd.f32 %v790_v0, %v676_v4  ;;  %v871_v7 = vpop.f32.mrb[11].mxu1 }
 0x464   : > { %682 = vst [vmem:[%s272_s20] sm:$0xff] %v680_v5  ;;  %v681_v8 = vmax.f32 %v677_v6, 0.0 }
 0x466   : > { %683 = vst [vmem:[%s272_s20 + $0x8] sm:$0xff] %v681_v8 }
 0x467   : > { %945 = shalt.err (!%p942_p3)
}
 0x468   : > { %s946_s16 = scalar_lea.hbm %s1191_s8, 256  ;;  %s950_s19 = scalar_lea.hbm %s1241_s7, 512 }
 0x469   : > { %p947_p4 = scmp.ne.s32.totalorder %s1191_s8, %s946_s16  ;;  %p951_p9 = scmp.lt.u32.totalorder %s1191_s8, %s1241_s7 }
 0x46a   : > { %p952_p10 = scmp.lt.u32.totalorder %s950_s19, %s946_s16  ;;  %p954_p12 = scmp.lt.u32.totalorder %s946_s16, %s1191_s8 }
 0x46b   : > { %p948_p7 = pnand %p947_p4, %p1079_p5 }
 0x46c   : > { %p953_p11 = por %p952_p10, %p951_p9 }
 0x46d   : > { %p949_p8 = pneg %p948_p7 }
 0x46e   : > { %p955_p13 = por %p954_p12, %p953_p11 }
 0x470   : > { %p956_p0 = pnand %p955_p13, %p949_p8 }
 0x472   : > { %959 = shalt.err (!%p956_p0)
}
 0x473   : > { %s999_s23 = smov 128   ;;  %s1000_s29 = smov 8  }
 0x474   : > { %872 = dma.vmem_to_hbm [thread:$0]  (%p1079_p5), %s1186_s21, 256, %s1191_s8, %s1193_s9, %s999_s23, %s999_s23, %s1000_s29  }
 0x475 PF: > { %p878_p1 = scmp.ge.s32.totalorder %s994_s27, 2  ;;  %s713_s28 = sand.u32 1, %s982_s24  }
 0x476   : > { %s714_s13 = scalar_lea.sflag [#allocation3], %s713_s28 }
 0x477   : > { %p875_p2 = pnand %p878_p1, %p1083_p6 }
 0x479   : > { %977 = dma.done.wait (!%p875_p2), %s714_s13, 256  }
 0x47a   : > { %979 = vsyncadd (!%p875_p2), %s714_s13, 4294967040  ;;  %p17_p3 = scmp.ge.s32.totalorder %s1066_s30, 4   ;;  %s1244_s24 = smov %s986_s25 }
 0x47b   : > { %s1245_s25 = smov %s990_s26  ;;  %s1246_s26 = smov %s1077_s10 }
 0x47c   : > { %s1247_s27 = smov %s1066_s30  ;;  %19 = sbr.rel (!%p17_p3) target bundleno = 3 (0x3), region = 83 }
 0x483   :  { %719 = vsyncpa [#allocation3], 1 }
 0x484   :  { %721 = vsyncpa [#allocation3 + $0x1], 1 }

</bundles_post_ra>
